<compile_context>
chip_gen: v5e
topology: v5e:2x2
jax: 0.10.0
libtpu: 0.0.40
codegen_flags: <defaults>
</compile_context>

<pallas_src>
import functools

import jax
import jax.numpy as jnp
from jax.experimental import pallas as pl
from jax.experimental.pallas import tpu as pltpu


def _round_up(n, m):
    return ((n + m - 1) // m) * m


def _vmem_capacity_bytes():
    """Per-core VMEM capacity with a conservative fallback (v7x = 64 MiB)."""
    try:
        return int(pltpu.get_tpu_info().vmem_capacity_bytes)
    except Exception:
        return 64 * 1024 * 1024


def _mlp_kernel(x_ref, *refs, num_linear):
    """Fused MLP on one (TB, dim_in) batch tile.

    refs = (w0, b0, w1, b1, ..., w_{L-1}, b_{L-1}, o_ref).
    Weights may be bf16 or f32; accumulation, bias add and SiLU are f32.
    """
    o_ref = refs[-1]
    params = refs[:-1]
    h = x_ref[...]                                         # (TB, d0) f32
    for i in range(num_linear):
        w = params[2 * i][...]                             # (d_i, d_{i+1})
        b = params[2 * i + 1][...]                         # (1,  d_{i+1}) f32
        h = jnp.dot(h.astype(w.dtype), w,
                    preferred_element_type=jnp.float32) + b
        if i < num_linear - 1:
            h = h * jax.nn.sigmoid(h)                      # SiLU; sigmoid -> EUP
    o_ref[...] = h.astype(o_ref.dtype)


def mlp_forward(x, weights, biases, *, block_batch=512, param_dtype=jnp.bfloat16):
    """Fused MLP forward.

    x:       (B, dim_in)
    weights: list of (fan_in_i, fan_out_i) arrays
    biases:  list of (fan_out_i,) or (1, fan_out_i) arrays
    param_dtype: jnp.bfloat16 (native MXU fast path, default) or jnp.float32
                 (exact PyTorch-numerics path).
    """
    num_linear = len(weights)
    B, dim_in = x.shape
    dims = [dim_in] + [int(w.shape[1]) for w in weights]
    out_dtype = x.dtype
    x = x.astype(jnp.float32)

    # Batch tile: multiple of 8 (f32 sublane tiling); aim for >= 2 grid steps
    # when possible so v7x's 2 TensorCores both get work; capped by block_batch
    # (default 512 is a multiple of 256 for the v6e/v7x 2x256^2 MXU).
    TB = min(_round_up(block_batch, 8), max(8, _round_up(pl.cdiv(B, 2), 8)))
    B_p = _round_up(B, TB)
    grid = (B_p // TB,)

    # Only the batch dim is padded (cheap, zero rows), never the feature dims.
    if B_p != B:
        x_in = jnp.zeros((B_p, dim_in), jnp.float32).at[:B].set(x)
    else:
        x_in = x

    params = []
    for w, b in zip(weights, biases):
        params.append(jnp.asarray(w, param_dtype))
        params.append(jnp.asarray(b, jnp.float32).reshape(1, -1))

    kernel = functools.partial(_mlp_kernel, num_linear=num_linear)
    vmem_cap = _vmem_capacity_bytes()

    flops = 2 * B_p * sum(dims[i] * dims[i + 1] for i in range(num_linear))
    transcendentals = B_p * sum(dims[1:-1]) if num_linear > 1 else 0
    raw_param_bytes = sum(int(p.size) * p.dtype.itemsize for p in params)
    bytes_accessed = (int(x_in.size) + B_p * dims[-1]) * 4 + raw_param_bytes

    def run(single_buffer_params):
        # ---- VMEM working-set estimate with headroom under the chip cap ----
        nbuf = 1 if single_buffer_params else 2
        param_bytes = nbuf * raw_param_bytes
        io_bytes = 2 * TB * (dims[0] + dims[-1]) * 4        # double-buffered x/out
        live_bytes = 2 * TB * max(dims) * 4                 # live h + SiLU temp (f32)
        vmem_limit = max(32 << 20, param_bytes + io_bytes + live_bytes + (4 << 20))
        vmem_limit = int(min(vmem_limit, vmem_cap - (8 << 20)))

        # ---- BlockSpecs: x/out tiled over batch; params fully resident -----
        in_specs = [pl.BlockSpec((TB, dims[0]), lambda i: (i, 0))]
        for p in params:
            if single_buffer_params:
                in_specs.append(pl.BlockSpec(p.shape, lambda i: (0, 0),
                                             pipeline_mode=pl.Buffered(1)))
            else:
                in_specs.append(pl.BlockSpec(p.shape, lambda i: (0, 0)))
        out_specs = pl.BlockSpec((TB, dims[-1]), lambda i: (i, 0))

        out_p = pl.pallas_call(
            kernel,
            out_shape=jax.ShapeDtypeStruct((B_p, dims[-1]), jnp.float32),
            grid=grid,
            in_specs=in_specs,
            out_specs=out_specs,
            compiler_params=pltpu.CompilerParams(
                dimension_semantics=("parallel",),   # v7x: shard batch over 2 TCs
                vmem_limit_bytes=vmem_limit,
            ),
            cost_estimate=pl.CostEstimate(
                flops=flops,
                transcendentals=transcendentals,
                bytes_accessed=bytes_accessed,
            ),
        )(x_in, *params)
        return jax.block_until_ready(out_p)

    try:
        out_p = run(single_buffer_params=True)
    except Exception:
        # TODO(synk): drop this fallback once pl.Buffered(1) on grid-invariant
        # params is confirmed supported by the installed JAX/Mosaic version.
        out_p = run(single_buffer_params=False)

    out = out_p if B_p == B else out_p[:B]
    return out.astype(out_dtype)


def init_mlp_params(key, dim_in, dim_out, dim_hidden, num_layers):
    """Init matching the PyTorch module: trunc_normal(std=sqrt(1/fan_in))
    weights, zero biases.  Weights stored as (fan_in, fan_out)."""
    dims = [dim_in] + [dim_hidden] * (num_layers - 1) + [dim_out]
    weights, biases = [], []
    for i in range(num_layers):
        fan_in, fan_out = dims[i], dims[i + 1]
        key, sub = jax.random.split(key)
        std = (1.0 / fan_in) ** 0.5
        w = std * jax.random.truncated_normal(
            sub, -2.0, 2.0, (fan_in, fan_out), dtype=jnp.float32)
        b = jnp.zeros((1, fan_out), dtype=jnp.float32)
        weights.append(w)
        biases.append(b)
    return weights, biases


def mlp_reference(x, weights, biases):
    """Pure-JAX reference for correctness check."""
    h = x
    for i, (w, b) in enumerate(zip(weights, biases)):
        h = h @ w + b
        if i < len(weights) - 1:
            h = h * jax.nn.sigmoid(h)
    return h


if __name__ == "__main__":
    key = jax.random.PRNGKey(0)

    # Small shapes consistent with the module's forward.
    batch, dim_in, dim_hidden, dim_out, num_layers = 64, 4, 32, 2, 3

    k_x, k_p = jax.random.split(key)
    x = jax.random.normal(k_x, (batch, dim_in), dtype=jnp.float32)
    weights, biases = init_mlp_params(k_p, dim_in, dim_out, dim_hidden, num_layers)

    ref = mlp_reference(x, weights, biases)

    # Exact f32 path (matches the PyTorch module numerics). block_batch=32
    # -> TB=32, grid=(2,), exercising the multi-step batch pipeline.
    out_f32 = mlp_forward(x, weights, biases, block_batch=32,
                          param_dtype=jnp.float32)
    out_f32 = jax.block_until_ready(out_f32)
    assert out_f32.shape == (batch, dim_out)
    assert jnp.allclose(out_f32, ref, atol=1e-4, rtol=1e-4)

    # Default bf16 matmul-input path (native MXU on v5e/v6e/v7x), f32
    # accumulate + f32 bias/SiLU; looser tolerance (weight+activation bf16).
    out_bf16 = mlp_forward(x, weights, biases, block_batch=32)
    out_bf16 = jax.block_until_ready(out_bf16)
    assert out_bf16.shape == (batch, dim_out)
    assert jnp.allclose(out_bf16, ref, atol=3e-2, rtol=3e-2)

    print("KERNEL_OK")
</pallas_src>

<mosaic_0001>
module attributes {stable_mosaic.version = 11 : i64} {
  func.func @_mlp_kernel(%arg0: i32, %arg1: memref<32x4xf32, #tpu.memory_space<vmem>>, %arg2: memref<4x32xf32, #tpu.memory_space<vmem>>, %arg3: memref<1x32xf32, #tpu.memory_space<vmem>>, %arg4: memref<32x32xf32, #tpu.memory_space<vmem>>, %arg5: memref<1x32xf32, #tpu.memory_space<vmem>>, %arg6: memref<32x2xf32, #tpu.memory_space<vmem>>, %arg7: memref<1x2xf32, #tpu.memory_space<vmem>>, %arg8: memref<32x2xf32, #tpu.memory_space<vmem>>) attributes {dimension_semantics = [#tpu.dimension_semantics<parallel>], iteration_bounds = array<i64: 2>, scalar_prefetch = 0 : i64, scratch_operands = 0 : i64, tpu.core_type = #tpu.core_type<tc>, window_params = [{transform_indices = @transform_0, window_bounds = array<i64: 32, 4>}, {pipeline_mode = #tpu.pipeline_mode<synchronous>, transform_indices = @transform_1, window_bounds = array<i64: 4, 32>}, {pipeline_mode = #tpu.pipeline_mode<synchronous>, transform_indices = @transform_2, window_bounds = array<i64: 1, 32>}, {pipeline_mode = #tpu.pipeline_mode<synchronous>, transform_indices = @transform_3, window_bounds = array<i64: 32, 32>}, {pipeline_mode = #tpu.pipeline_mode<synchronous>, transform_indices = @transform_4, window_bounds = array<i64: 1, 32>}, {pipeline_mode = #tpu.pipeline_mode<synchronous>, transform_indices = @transform_5, window_bounds = array<i64: 32, 2>}, {pipeline_mode = #tpu.pipeline_mode<synchronous>, transform_indices = @transform_6, window_bounds = array<i64: 1, 2>}, {transform_indices = @transform_7, window_bounds = array<i64: 32, 2>}]} {
    %c0 = arith.constant 0 : index
    %c0_0 = arith.constant 0 : index
    %0 = vector.load %arg1[%c0, %c0_0] : memref<32x4xf32, #tpu.memory_space<vmem>>, vector<32x4xf32>
    %c0_1 = arith.constant 0 : index
    %c0_2 = arith.constant 0 : index
    %1 = vector.load %arg2[%c0_1, %c0_2] : memref<4x32xf32, #tpu.memory_space<vmem>>, vector<4x32xf32>
    %c0_3 = arith.constant 0 : index
    %c0_4 = arith.constant 0 : index
    %2 = vector.load %arg3[%c0_3, %c0_4] : memref<1x32xf32, #tpu.memory_space<vmem>>, vector<1x32xf32>
    %cst = arith.constant dense<0.000000e+00> : vector<32x32xf32>
    %3 = tpu.matmul %0, %1, %cst {dimension_numbers = #tpu.dot_dimension_numbers<[1], [0], [0], [1], [0, 0, 1, 1], [], []>} : vector<32x4xf32>, vector<4x32xf32>, vector<32x32xf32> -> vector<32x32xf32>
    %4 = vector.broadcast %2 : vector<1x32xf32> to vector<32x32xf32>
    %5 = arith.addf %3, %4 : vector<32x32xf32>
    %6 = arith.negf %5 : vector<32x32xf32>
    %7 = math.exp %6 : vector<32x32xf32>
    %cst_5 = arith.constant 1.000000e+00 : f32
    %8 = vector.broadcast %cst_5 : f32 to vector<32x32xf32>
    %9 = arith.addf %8, %7 : vector<32x32xf32>
    %10 = arith.divf %8, %9 : vector<32x32xf32>
    %11 = arith.mulf %5, %10 : vector<32x32xf32>
    %c0_6 = arith.constant 0 : index
    %c0_7 = arith.constant 0 : index
    %12 = vector.load %arg4[%c0_6, %c0_7] : memref<32x32xf32, #tpu.memory_space<vmem>>, vector<32x32xf32>
    %c0_8 = arith.constant 0 : index
    %c0_9 = arith.constant 0 : index
    %13 = vector.load %arg5[%c0_8, %c0_9] : memref<1x32xf32, #tpu.memory_space<vmem>>, vector<1x32xf32>
    %cst_10 = arith.constant dense<0.000000e+00> : vector<32x32xf32>
    %14 = tpu.matmul %11, %12, %cst_10 {dimension_numbers = #tpu.dot_dimension_numbers<[1], [0], [0], [1], [0, 0, 1, 1], [], []>} : vector<32x32xf32>, vector<32x32xf32>, vector<32x32xf32> -> vector<32x32xf32>
    %15 = vector.broadcast %13 : vector<1x32xf32> to vector<32x32xf32>
    %16 = arith.addf %14, %15 : vector<32x32xf32>
    %17 = arith.negf %16 : vector<32x32xf32>
    %18 = math.exp %17 : vector<32x32xf32>
    %cst_11 = arith.constant 1.000000e+00 : f32
    %19 = vector.broadcast %cst_11 : f32 to vector<32x32xf32>
    %20 = arith.addf %19, %18 : vector<32x32xf32>
    %21 = arith.divf %19, %20 : vector<32x32xf32>
    %22 = arith.mulf %16, %21 : vector<32x32xf32>
    %c0_12 = arith.constant 0 : index
    %c0_13 = arith.constant 0 : index
    %23 = vector.load %arg6[%c0_12, %c0_13] : memref<32x2xf32, #tpu.memory_space<vmem>>, vector<32x2xf32>
    %c0_14 = arith.constant 0 : index
    %c0_15 = arith.constant 0 : index
    %24 = vector.load %arg7[%c0_14, %c0_15] : memref<1x2xf32, #tpu.memory_space<vmem>>, vector<1x2xf32>
    %cst_16 = arith.constant dense<0.000000e+00> : vector<32x2xf32>
    %25 = tpu.matmul %22, %23, %cst_16 {dimension_numbers = #tpu.dot_dimension_numbers<[1], [0], [0], [1], [0, 0, 1, 1], [], []>} : vector<32x32xf32>, vector<32x2xf32>, vector<32x2xf32> -> vector<32x2xf32>
    %26 = vector.broadcast %24 : vector<1x2xf32> to vector<32x2xf32>
    %27 = arith.addf %25, %26 : vector<32x2xf32>
    %c0_17 = arith.constant 0 : index
    %c0_18 = arith.constant 0 : index
    %28 = vector.load %arg8[%c0_17, %c0_18] : memref<32x2xf32, #tpu.memory_space<vmem>>, vector<32x2xf32>
    tpu.vector_store %arg8[%c0_17, %c0_18], %27 {strides = array<i32>} : memref<32x2xf32, #tpu.memory_space<vmem>>, vector<32x2xf32>,
    return
  }
  func.func @transform_0(%arg0: i32) -> (i32, i32) {
    %c0_i32 = arith.constant 0 : i32
    %c0_i32_0 = arith.constant 0 : i32
    return %arg0, %c0_i32 : i32, i32
  }
  func.func @transform_1(%arg0: i32) -> (i32, i32) {
    %c0_i32 = arith.constant 0 : i32
    %c0_i32_0 = arith.constant 0 : i32
    %c0_i32_1 = arith.constant 0 : i32
    return %c0_i32, %c0_i32_0 : i32, i32
  }
  func.func @transform_2(%arg0: i32) -> (i32, i32) {
    %c0_i32 = arith.constant 0 : i32
    %c0_i32_0 = arith.constant 0 : i32
    %c0_i32_1 = arith.constant 0 : i32
    return %c0_i32, %c0_i32_0 : i32, i32
  }
  func.func @transform_3(%arg0: i32) -> (i32, i32) {
    %c0_i32 = arith.constant 0 : i32
    %c0_i32_0 = arith.constant 0 : i32
    %c0_i32_1 = arith.constant 0 : i32
    return %c0_i32, %c0_i32_0 : i32, i32
  }
  func.func @transform_4(%arg0: i32) -> (i32, i32) {
    %c0_i32 = arith.constant 0 : i32
    %c0_i32_0 = arith.constant 0 : i32
    %c0_i32_1 = arith.constant 0 : i32
    return %c0_i32, %c0_i32_0 : i32, i32
  }
  func.func @transform_5(%arg0: i32) -> (i32, i32) {
    %c0_i32 = arith.constant 0 : i32
    %c0_i32_0 = arith.constant 0 : i32
    %c0_i32_1 = arith.constant 0 : i32
    return %c0_i32, %c0_i32_0 : i32, i32
  }
  func.func @transform_6(%arg0: i32) -> (i32, i32) {
    %c0_i32 = arith.constant 0 : i32
    %c0_i32_0 = arith.constant 0 : i32
    %c0_i32_1 = arith.constant 0 : i32
    return %c0_i32, %c0_i32_0 : i32, i32
  }
  func.func @transform_7(%arg0: i32) -> (i32, i32) {
    %c0_i32 = arith.constant 0 : i32
    %c0_i32_0 = arith.constant 0 : i32
    return %arg0, %c0_i32 : i32, i32
  }
}

module attributes {stable_mosaic.version = 11 : i64} {
  func.func @_mlp_kernel(%arg0: i32, %arg1: memref<32x4xf32, #tpu.memory_space<vmem>>, %arg2: memref<4x32xf32, #tpu.memory_space<vmem>>, %arg3: memref<1x32xf32, #tpu.memory_space<vmem>>, %arg4: memref<32x32xf32, #tpu.memory_space<vmem>>, %arg5: memref<1x32xf32, #tpu.memory_space<vmem>>, %arg6: memref<32x2xf32, #tpu.memory_space<vmem>>, %arg7: memref<1x2xf32, #tpu.memory_space<vmem>>, %arg8: memref<32x2xf32, #tpu.memory_space<vmem>>) attributes {dimension_semantics = [#tpu.dimension_semantics<parallel>], iteration_bounds = array<i64: 2>, scalar_prefetch = 0 : i64, scratch_operands = 0 : i64, tpu.core_type = #tpu.core_type<tc>, window_params = [{transform_indices = @transform_0, window_bounds = array<i64: 32, 4>}, {pipeline_mode = #tpu.pipeline_mode<synchronous>, transform_indices = @transform_1, window_bounds = array<i64: 4, 32>}, {pipeline_mode = #tpu.pipeline_mode<synchronous>, transform_indices = @transform_2, window_bounds = array<i64: 1, 32>}, {pipeline_mode = #tpu.pipeline_mode<synchronous>, transform_indices = @transform_3, window_bounds = array<i64: 32, 32>}, {pipeline_mode = #tpu.pipeline_mode<synchronous>, transform_indices = @transform_4, window_bounds = array<i64: 1, 32>}, {pipeline_mode = #tpu.pipeline_mode<synchronous>, transform_indices = @transform_5, window_bounds = array<i64: 32, 2>}, {pipeline_mode = #tpu.pipeline_mode<synchronous>, transform_indices = @transform_6, window_bounds = array<i64: 1, 2>}, {transform_indices = @transform_7, window_bounds = array<i64: 32, 2>}]} {
    %c0 = arith.constant 0 : index
    %c0_0 = arith.constant 0 : index
    %0 = vector.load %arg1[%c0, %c0_0] : memref<32x4xf32, #tpu.memory_space<vmem>>, vector<32x4xf32>
    %c0_1 = arith.constant 0 : index
    %c0_2 = arith.constant 0 : index
    %1 = vector.load %arg2[%c0_1, %c0_2] : memref<4x32xf32, #tpu.memory_space<vmem>>, vector<4x32xf32>
    %c0_3 = arith.constant 0 : index
    %c0_4 = arith.constant 0 : index
    %2 = vector.load %arg3[%c0_3, %c0_4] : memref<1x32xf32, #tpu.memory_space<vmem>>, vector<1x32xf32>
    %cst = arith.constant dense<0.000000e+00> : vector<32x32xf32>
    %3 = tpu.matmul %0, %1, %cst {dimension_numbers = #tpu.dot_dimension_numbers<[1], [0], [0], [1], [0, 0, 1, 1], [], []>} : vector<32x4xf32>, vector<4x32xf32>, vector<32x32xf32> -> vector<32x32xf32>
    %4 = vector.broadcast %2 : vector<1x32xf32> to vector<32x32xf32>
    %5 = arith.addf %3, %4 : vector<32x32xf32>
    %6 = arith.negf %5 : vector<32x32xf32>
    %7 = math.exp %6 : vector<32x32xf32>
    %cst_5 = arith.constant 1.000000e+00 : f32
    %8 = vector.broadcast %cst_5 : f32 to vector<32x32xf32>
    %9 = arith.addf %8, %7 : vector<32x32xf32>
    %10 = arith.divf %8, %9 : vector<32x32xf32>
    %11 = arith.mulf %5, %10 : vector<32x32xf32>
    %c0_6 = arith.constant 0 : index
    %c0_7 = arith.constant 0 : index
    %12 = vector.load %arg4[%c0_6, %c0_7] : memref<32x32xf32, #tpu.memory_space<vmem>>, vector<32x32xf32>
    %c0_8 = arith.constant 0 : index
    %c0_9 = arith.constant 0 : index
    %13 = vector.load %arg5[%c0_8, %c0_9] : memref<1x32xf32, #tpu.memory_space<vmem>>, vector<1x32xf32>
    %cst_10 = arith.constant dense<0.000000e+00> : vector<32x32xf32>
    %14 = tpu.matmul %11, %12, %cst_10 {dimension_numbers = #tpu.dot_dimension_numbers<[1], [0], [0], [1], [0, 0, 1, 1], [], []>} : vector<32x32xf32>, vector<32x32xf32>, vector<32x32xf32> -> vector<32x32xf32>
    %15 = vector.broadcast %13 : vector<1x32xf32> to vector<32x32xf32>
    %16 = arith.addf %14, %15 : vector<32x32xf32>
    %17 = arith.negf %16 : vector<32x32xf32>
    %18 = math.exp %17 : vector<32x32xf32>
    %cst_11 = arith.constant 1.000000e+00 : f32
    %19 = vector.broadcast %cst_11 : f32 to vector<32x32xf32>
    %20 = arith.addf %19, %18 : vector<32x32xf32>
    %21 = arith.divf %19, %20 : vector<32x32xf32>
    %22 = arith.mulf %16, %21 : vector<32x32xf32>
    %c0_12 = arith.constant 0 : index
    %c0_13 = arith.constant 0 : index
    %23 = vector.load %arg6[%c0_12, %c0_13] : memref<32x2xf32, #tpu.memory_space<vmem>>, vector<32x2xf32>
    %c0_14 = arith.constant 0 : index
    %c0_15 = arith.constant 0 : index
    %24 = vector.load %arg7[%c0_14, %c0_15] : memref<1x2xf32, #tpu.memory_space<vmem>>, vector<1x2xf32>
    %cst_16 = arith.constant dense<0.000000e+00> : vector<32x2xf32>
    %25 = tpu.matmul %22, %23, %cst_16 {dimension_numbers = #tpu.dot_dimension_numbers<[1], [0], [0], [1], [0, 0, 1, 1], [], []>} : vector<32x32xf32>, vector<32x2xf32>, vector<32x2xf32> -> vector<32x2xf32>
    %26 = vector.broadcast %24 : vector<1x2xf32> to vector<32x2xf32>
    %27 = arith.addf %25, %26 : vector<32x2xf32>
    %c0_17 = arith.constant 0 : index
    %c0_18 = arith.constant 0 : index
    %28 = vector.load %arg8[%c0_17, %c0_18] : memref<32x2xf32, #tpu.memory_space<vmem>>, vector<32x2xf32>
    tpu.vector_store %arg8[%c0_17, %c0_18], %27 {strides = array<i32>} : memref<32x2xf32, #tpu.memory_space<vmem>>, vector<32x2xf32>,
    return
  }
  func.func @transform_0(%arg0: i32) -> (i32, i32) {
    %c0_i32 = arith.constant 0 : i32
    %c0_i32_0 = arith.constant 0 : i32
    return %arg0, %c0_i32 : i32, i32
  }
  func.func @transform_1(%arg0: i32) -> (i32, i32) {
    %c0_i32 = arith.constant 0 : i32
    %c0_i32_0 = arith.constant 0 : i32
    %c0_i32_1 = arith.constant 0 : i32
    return %c0_i32, %c0_i32_0 : i32, i32
  }
  func.func @transform_2(%arg0: i32) -> (i32, i32) {
    %c0_i32 = arith.constant 0 : i32
    %c0_i32_0 = arith.constant 0 : i32
    %c0_i32_1 = arith.constant 0 : i32
    return %c0_i32, %c0_i32_0 : i32, i32
  }
  func.func @transform_3(%arg0: i32) -> (i32, i32) {
    %c0_i32 = arith.constant 0 : i32
    %c0_i32_0 = arith.constant 0 : i32
    %c0_i32_1 = arith.constant 0 : i32
    return %c0_i32, %c0_i32_0 : i32, i32
  }
  func.func @transform_4(%arg0: i32) -> (i32, i32) {
    %c0_i32 = arith.constant 0 : i32
    %c0_i32_0 = arith.constant 0 : i32
    %c0_i32_1 = arith.constant 0 : i32
    return %c0_i32, %c0_i32_0 : i32, i32
  }
  func.func @transform_5(%arg0: i32) -> (i32, i32) {
    %c0_i32 = arith.constant 0 : i32
    %c0_i32_0 = arith.constant 0 : i32
    %c0_i32_1 = arith.constant 0 : i32
    return %c0_i32, %c0_i32_0 : i32, i32
  }
  func.func @transform_6(%arg0: i32) -> (i32, i32) {
    %c0_i32 = arith.constant 0 : i32
    %c0_i32_0 = arith.constant 0 : i32
    %c0_i32_1 = arith.constant 0 : i32
    return %c0_i32, %c0_i32_0 : i32, i32
  }
  func.func @transform_7(%arg0: i32) -> (i32, i32) {
    %c0_i32 = arith.constant 0 : i32
    %c0_i32_0 = arith.constant 0 : i32
    return %arg0, %c0_i32 : i32, i32
  }
}

</mosaic_0001>

<bundles_post_ra>
// kernel: tpu_custom_call.1
= control target key start
LH: loop header
LB: loop body
LE: loop exit
PB: predicated region body
PF: predicated region fallthrough
CT: control target
= control target key end

     0   :  { %s788_s24 = smov 0   ;;  %s864_s0 = inlined_call_operand.vmem [shape: f32[64,4], index: 0, kind: input, shape index: {}]   ;;  %s865_s1 = inlined_call_operand.vmem [shape: f32[4,32], index: 1, kind: input, shape index: {}]   ;;  %s866_s2 = inlined_call_operand.vmem [shape: f32[1,32], index: 2, kind: input, shape index: {}]   ;;  %s867_s3 = inlined_call_operand.vmem [shape: f32[32,32], index: 3, kind: input, shape index: {}]   ;;  %s868_s4 = inlined_call_operand.vmem [shape: f32[1,32], index: 4, kind: input, shape index: {}]   ;;  %s869_s5 = inlined_call_operand.vmem [shape: f32[32,2], index: 5, kind: input, shape index: {}]   ;;  %s870_s6 = inlined_call_operand.vmem [shape: f32[1,2], index: 6, kind: input, shape index: {}]   ;;  %s871_s7 = inlined_call_operand.vmem [shape: f32[64,2], index: 7, kind: output, shape index: {}]  }
   0x1 LB: > { %s657_s25 = sadd.s32 4294967295, %s746_s24   ;;  %p661_p0 = scmp.ge.s32.totalorder %s746_s24, 1  ;;  %s746_s24 = sphi %s788_s24, %s17_s24  }
   0x2   : > { %p238_p1 = scmp.lt.s32.totalorder %s746_s24, 3 }
   0x4   : > { %p239_p2 = pnand %p661_p0, %p238_p1 }
   0x5   : > { %s662_s28 = sshll.u32 (!%p239_p2), %s657_s25, 2 }
   0x6   : > { %242 = sbr.rel (%p239_p2) target bundleno = 496 (0x1f0), region = 48  ;;  %p271_p3 = scmp.lt.s32.totalorder (!%p239_p2), %s662_s28, 7 }
   0xb   : > { %v286_v0 = vld [vmem:[%s865_s1] sm:$0xf]  ;;  %vm304_vm0 = vcmask 1043456   ;;  %s873_s28 = smov (!%p271_p3, %s662_s28), 7  ;;  %vm291_vm1 = vcmask 31744   ;;  %v420_v5 = vld [vmem:[%s867_s3 + $0x18] sm:$0xff] }
   0xc   : > { %666 = vmatpush.msk.msra.mxu0 %vm304_vm0, %v286_v0  ;;  %s663_s29 = sshll.u32 %s873_s28, 3  ;;  %450 = vmatpush.msra.mxu1 %v420_v5  ;;  %v419_v6 = vld [vmem:[%s867_s3 + $0x10] sm:$0xff]  ;;  %v705_v7 = vld [vmem:[%s866_s2] ss:$0 sm:$0xff]  ;;  %v418_v8 = vld [vmem:[%s867_s3 + $0x8] sm:$0xff]  ;;  %vm425_vm6 = vcmask 261120  }
   0xd   : > { %s274_s9 = scalar_lea.vmem %s864_s0, %s663_s29  ;;  %689 = vmatpush.msra.mxu3 %v420_v5  ;;  %v417_v10 = vld [vmem:[%s867_s3] sm:$0xff]  ;;  %s280_s14 = scalar_lea.vmem %s871_s7, %s663_s29 }
   0xe   : > { %v282_v1 = vld [vmem:[%s274_s9] sm:$0xff]  ;;  %v283_v2 = vld [vmem:[%s274_s9 + $0x8] sm:$0xff]  ;;  %v284_v3 = vld [vmem:[%s274_s9 + $0x10] sm:$0xff]  ;;  %451 = vmatpush.msra.mxu1 %v419_v6 }
   0xf   : > { %667 = vmatmul.msk.f32.vlgmr.msra.gmra.mxu0 %vm291_vm1, %v282_v1  ;;  %v285_v4 = vld [vmem:[%s274_s9 + $0x18] sm:$0xff]  ;;  %690 = vmatpush.msra.mxu3 %v419_v6 }
  0x10   : > { %452 = vmatpush.msra.mxu1 %v418_v8 }
  0x11   : > { %691 = vmatpush.msra.mxu3 %v418_v8 }
  0x12   : > { %453 = vmatpush.msra.mxu1 %v417_v10 }
  0x13   : > { %692 = vmatpush.msra.mxu3 %v417_v10  ;;  %v550_v10 = vld [vmem:[%s869_s5 + $0x18] sm:$0xff] }
  0x14   : > { %579 = vmatpush.msrb.mxu1 %v550_v10  ;;  %693 = vmatpush.msra.mxu2 %v550_v10 }
  0x17   : > { %668 = vmatmul.msk.f32.gmra.mxu0 %vm291_vm1, %v283_v2 }
  0x1f   : > { %669 = vmatmul.msk.f32.gmra.mxu0 %vm291_vm1, %v284_v3 }
  0x27   : > { %670 = vmatmul.msk.f32.gmra.mxu0 %vm291_vm1, %v285_v4 }
  0x8c   : > { %v325_v9 = vpop.f32.mrf.mxu0 }
  0x8d   : > { %v326_v11 = vadd.f32 %v705_v7, %v325_v9 }
  0x8f   : > { %v671_v12 = vmul.f32 -1.442695, %v326_v11 }
  0x91   : > { %708 = vpow2.f32 %v671_v12  ;;  %v706_v12 = vld [vmem:[%s868_s4] ss:$0 sm:$0xff] }
  0x94   : > { %v328_v13 = vpop.f32.mrf.mxu0 }
  0x95   : > { %v329_v14 = vadd.f32 %v705_v7, %v328_v13  ;;  %v548_v13 = vld [vmem:[%s869_s5 + $0x8] sm:$0xff] }
  0x97   : > { %v709_v15 = vpop.eup %708  ;;  %v672_v16 = vmul.f32 -1.442695, %v329_v14 }
  0x98   : > { %v349_v17 = vadd.f32 1.0, %v709_v15  ;;  %v547_v15 = vld [vmem:[%s869_s5] sm:$0xff] }
  0x99   : > { %710 = vpow2.f32 %v672_v16 }
  0x9a   : > { %712 = vrcp.f32 %v349_v17  ;;  %v364_v26 = vand.u32 2147483648, %v349_v17  ;;  %v362_v29 = vand.u32 2147483647, %v349_v17  ;;  %vm358_vm3 = vweird.f32 %v349_v17 }
  0x9c   : > { %v331_v18 = vpop.f32.mrf.mxu0  ;;  %v365_v35 = vor.u32 1.1754944e-38, %v364_v26  ;;  %vm363_vm5 = vcmp.eq.f32.partialorder %v362_v29, 8.507059e+37 }
  0x9d   : > { %v822_v19 = vadd.f32 %v705_v7, %v331_v18 }
  0x9f   : > { %v711_v20 = vpop.eup %710  ;;  %v673_v21 = vmul.f32 -1.442695, %v822_v19 }
  0xa0   : > { %v713_v22 = vpop.eup %712  ;;  %v350_v23 = vadd.f32 1.0, %v711_v20 }
  0xa1   : > { %v354_v24 = vmul.f32 %v713_v22, %v349_v17  ;;  %714 = vpow2.f32 %v673_v21  ;;  %vm359_vm2 = vweird.f32 %v713_v22 }
  0xa2   : > { %716 = vrcp.f32 %v350_v23  ;;  %vm360_vm4 = vmor %vm358_vm3, %vm359_vm2  ;;  %v379_v42 = vand.u32 2147483648, %v350_v23  ;;  %v377_v44 = vand.u32 2147483647, %v350_v23  ;;  %vm373_vm8 = vweird.f32 %v350_v23 }
  0xa3   : > { %v355_v25 = vsub.f32 1.0, %v354_v24 }
  0xa4   : > { %v334_v27 = vpop.f32.mrf.mxu0  ;;  %v380_v48 = vor.u32 1.1754944e-38, %v379_v42  ;;  %vm378_vm10 = vcmp.eq.f32.partialorder %v377_v44, 8.507059e+37 }
  0xa5   : > { %v356_v28 = vmul.f32 %v713_v22, %v355_v25  ;;  %v825_v30 = vadd.f32 %v705_v7, %v334_v27 }
  0xa7   : > { %v715_v31 = vpop.eup %714  ;;  %v357_v32 = vadd.f32 %v713_v22, %v356_v28  ;;  %v674_v33 = vmul.f32 -1.442695, %v825_v30 }
  0xa8   : > { %v717_v34 = vpop.eup %716  ;;  %v351_v36 = vadd.f32 1.0, %v715_v31 }
  0xa9   : > { %v361_v37 = vsel %vm360_vm4, %v713_v22, %v357_v32  ;;  %v369_v38 = vmul.f32 %v717_v34, %v350_v23  ;;  %718 = vpow2.f32 %v674_v33  ;;  %vm374_vm7 = vweird.f32 %v717_v34 }
  0xaa   : > { %v366_v39 = vsel %vm363_vm5, %v365_v35, %v361_v37  ;;  %720 = vrcp.f32 %v351_v36  ;;  %vm375_vm9 = vmor %vm373_vm8, %vm374_vm7  ;;  %v394_v55 = vand.u32 2147483648, %v351_v36  ;;  %v392_v57 = vand.u32 2147483647, %v351_v36 }
  0xab   : > { %v413_v40 = vmul.f32 %v366_v39, %v326_v11  ;;  %v370_v41 = vsub.f32 1.0, %v369_v38  ;;  %vm388_vm12 = vweird.f32 %v351_v36  ;;  %v549_v11 = vld [vmem:[%s869_s5 + $0x10] sm:$0xff] }
  0xac   : > { %v395_v60 = vor.u32 1.1754944e-38, %v394_v55  ;;  %vm393_vm14 = vcmp.eq.f32.partialorder %v392_v57, 8.507059e+37  ;;  %580 = vmatpush.msrb.mxu1 %v549_v11  ;;  %694 = vmatpush.msra.mxu2 %v549_v11 }
  0xad   : > { %v371_v43 = vmul.f32 %v717_v34, %v370_v41  ;;  %675 = vmatmul.msk.f32.vlgmr.msra.gmra.mxu1 %vm425_vm6, %v413_v40 }
  0xae   : > { %581 = vmatpush.msrb.mxu1 %v548_v13  ;;  %695 = vmatpush.msra.mxu2 %v548_v13 }
  0xaf   : > { %v719_v45 = vpop.eup %718  ;;  %v372_v46 = vadd.f32 %v717_v34, %v371_v43 }
  0xb0   : > { %v721_v47 = vpop.eup %720  ;;  %v352_v49 = vadd.f32 1.0, %v719_v45  ;;  %582 = vmatpush.msrb.mxu1 %v547_v15  ;;  %696 = vmatpush.msra.mxu2 %v547_v15  ;;  %v707_v15 = vld [vmem:[%s870_s6] ss:$0 sm:$0xff] }
  0xb1   : > { %v376_v50 = vsel %vm375_vm9, %v717_v34, %v372_v46  ;;  %v384_v51 = vmul.f32 %v721_v47, %v351_v36  ;;  %vm389_vm11 = vweird.f32 %v721_v47 }
  0xb2   : > { %v381_v52 = vsel %vm378_vm10, %v380_v48, %v376_v50  ;;  %722 = vrcp.f32 %v352_v49  ;;  %vm390_vm13 = vmor %vm388_vm12, %vm389_vm11  ;;  %v409_v2 = vand.u32 2147483648, %v352_v49  ;;  %v407_v4 = vand.u32 2147483647, %v352_v49 }
  0xb3   : > { %v414_v53 = vmul.f32 %v381_v52, %v329_v14  ;;  %v385_v54 = vsub.f32 1.0, %v384_v51  ;;  %vm403_vm0 = vweird.f32 %v352_v49 }
  0xb4   : > { %v410_v6 = vor.u32 1.1754944e-38, %v409_v2  ;;  %vm408_vm2 = vcmp.eq.f32.partialorder %v407_v4, 8.507059e+37 }
  0xb5   : > { %v386_v56 = vmul.f32 %v721_v47, %v385_v54  ;;  %676 = vmatmul.msk.f32.vlgmr.msra.gmra.mxu3 %vm425_vm6, %v414_v53 }
  0xb7   : > { %v387_v58 = vadd.f32 %v721_v47, %v386_v56 }
  0xb8   : > { %v723_v59 = vpop.eup %722 }
  0xb9   : > { %v391_v61 = vsel %vm390_vm13, %v721_v47, %v387_v58  ;;  %v399_v62 = vmul.f32 %v723_v59, %v352_v49  ;;  %vm404_vm15 = vweird.f32 %v723_v59 }
  0xba   : > { %v396_v63 = vsel %vm393_vm14, %v395_v60, %v391_v61  ;;  %vm405_vm1 = vmor %vm403_vm0, %vm404_vm15 }
  0xbb   : > { %v415_v0 = vmul.f32 %v396_v63, %v822_v19  ;;  %v400_v1 = vsub.f32 1.0, %v399_v62 }
  0xbd   : > { %v401_v3 = vmul.f32 %v723_v59, %v400_v1  ;;  %677 = vmatmul.msk.f32.gmra.mxu3 %vm425_vm6, %v415_v0 }
  0xbf   : > { %v402_v5 = vadd.f32 %v723_v59, %v401_v3 }
  0xc1   : > { %v406_v7 = vsel %vm405_vm1, %v723_v59, %v402_v5 }
  0xc2   : > { %v411_v8 = vsel %vm408_vm2, %v410_v6, %v406_v7 }
  0xc3   : > { %v416_v9 = vmul.f32 %v411_v8, %v825_v30 }
  0xc5   : > { %678 = vmatmul.msk.f32.gmra.mxu3 %vm425_vm6, %v416_v9 }
 0x12a   : > { %v455_v14 = vpop.f32.mrf.mxu1 }
 0x12b   : > { %v456_v16 = vadd.f32 %v706_v12, %v455_v14 }
 0x12d   : > { %v679_v17 = vmul.f32 -1.442695, %v456_v16 }
 0x12f   : > { %724 = vpow2.f32 %v679_v17 }
 0x135   : > { %v725_v18 = vpop.eup %724 }
 0x136   : > { %v479_v19 = vadd.f32 1.0, %v725_v18 }
 0x138   : > { %726 = vrcp.f32 %v479_v19  ;;  %v458_v20 = vpop.f32.mrf.mxu3  ;;  %v494_v28 = vand.u32 2147483648, %v479_v19  ;;  %v492_v31 = vand.u32 2147483647, %v479_v19  ;;  %vm488_vm4 = vweird.f32 %v479_v19 }
 0x139   : > { %v459_v21 = vadd.f32 %v706_v12, %v458_v20 }
 0x13a   : > { %v495_v35 = vor.u32 1.1754944e-38, %v494_v28  ;;  %vm493_vm7 = vcmp.eq.f32.partialorder %v492_v31, 8.507059e+37 }
 0x13b   : > { %v680_v22 = vmul.f32 -1.442695, %v459_v21 }
 0x13d   : > { %728 = vpow2.f32 %v680_v22 }
 0x13e   : > { %v727_v23 = vpop.eup %726 }
 0x13f   : > { %v484_v24 = vmul.f32 %v727_v23, %v479_v19  ;;  %vm489_vm3 = vweird.f32 %v727_v23 }
 0x140   : > { %v461_v25 = vpop.f32.mrf.mxu3  ;;  %vm490_vm5 = vmor %vm488_vm4, %vm489_vm3  ;;  %vm596_vm4 = vcmask 15360  }
 0x141   : > { %v485_v26 = vsub.f32 1.0, %v484_v24  ;;  %v462_v27 = vadd.f32 %v706_v12, %v461_v25 }
 0x143   : > { %v729_v29 = vpop.eup %728  ;;  %v486_v30 = vmul.f32 %v727_v23, %v485_v26  ;;  %v681_v32 = vmul.f32 -1.442695, %v462_v27 }
 0x144   : > { %v480_v33 = vadd.f32 1.0, %v729_v29 }
 0x145   : > { %v487_v34 = vadd.f32 %v727_v23, %v486_v30  ;;  %730 = vpow2.f32 %v681_v32 }
 0x146   : > { %732 = vrcp.f32 %v480_v33  ;;  %v509_v47 = vand.u32 2147483648, %v480_v33  ;;  %v507_v49 = vand.u32 2147483647, %v480_v33  ;;  %vm503_vm9 = vweird.f32 %v480_v33 }
 0x147   : > { %v491_v36 = vsel %vm490_vm5, %v727_v23, %v487_v34 }
 0x148   : > { %v496_v37 = vsel %vm493_vm7, %v495_v35, %v491_v36  ;;  %v464_v38 = vpop.f32.mrf.mxu3  ;;  %v510_v53 = vor.u32 1.1754944e-38, %v509_v47  ;;  %vm508_vm11 = vcmp.eq.f32.partialorder %v507_v49, 8.507059e+37 }
 0x149   : > { %v543_v39 = vmul.f32 %v496_v37, %v456_v16  ;;  %v465_v40 = vadd.f32 %v706_v12, %v464_v38 }
 0x14b   : > { %v731_v41 = vpop.eup %730  ;;  %v682_v42 = vmul.f32 -1.442695, %v465_v40  ;;  %683 = vmatmul.msk.f32.vlgmr.msrb.gmra.mxu1 %vm425_vm6, %v543_v39 }
 0x14c   : > { %v733_v43 = vpop.eup %732  ;;  %v481_v44 = vadd.f32 1.0, %v731_v41 }
 0x14d   : > { %v499_v45 = vmul.f32 %v733_v43, %v480_v33  ;;  %734 = vpow2.f32 %v682_v42  ;;  %vm504_vm8 = vweird.f32 %v733_v43 }
 0x14e   : > { %736 = vrcp.f32 %v481_v44  ;;  %vm505_vm10 = vmor %vm503_vm9, %vm504_vm8  ;;  %v524_v60 = vand.u32 2147483648, %v481_v44  ;;  %v522_v62 = vand.u32 2147483647, %v481_v44  ;;  %vm518_vm13 = vweird.f32 %v481_v44 }
 0x14f   : > { %v500_v46 = vsub.f32 1.0, %v499_v45 }
 0x150   : > { %v525_v1 = vor.u32 1.1754944e-38, %v524_v60  ;;  %vm523_vm15 = vcmp.eq.f32.partialorder %v522_v62, 8.507059e+37 }
 0x151   : > { %v501_v48 = vmul.f32 %v733_v43, %v500_v46 }
 0x153   : > { %v735_v50 = vpop.eup %734  ;;  %v502_v51 = vadd.f32 %v733_v43, %v501_v48 }
 0x154   : > { %v737_v52 = vpop.eup %736  ;;  %v482_v54 = vadd.f32 1.0, %v735_v50 }
 0x155   : > { %v506_v55 = vsel %vm505_vm10, %v733_v43, %v502_v51  ;;  %v514_v56 = vmul.f32 %v737_v52, %v481_v44  ;;  %vm519_vm12 = vweird.f32 %v737_v52 }
 0x156   : > { %v511_v57 = vsel %vm508_vm11, %v510_v53, %v506_v55  ;;  %738 = vrcp.f32 %v482_v54  ;;  %vm520_vm14 = vmor %vm518_vm13, %vm519_vm12  ;;  %v539_v7 = vand.u32 2147483648, %v482_v54  ;;  %v537_v9 = vand.u32 2147483647, %v482_v54 }
 0x157   : > { %v544_v58 = vmul.f32 %v511_v57, %v459_v21  ;;  %v515_v59 = vsub.f32 1.0, %v514_v56  ;;  %vm533_vm1 = vweird.f32 %v482_v54 }
 0x158   : > { %v540_v11 = vor.u32 1.1754944e-38, %v539_v7  ;;  %vm538_vm3 = vcmp.eq.f32.partialorder %v537_v9, 8.507059e+37 }
 0x159   : > { %v516_v61 = vmul.f32 %v737_v52, %v515_v59  ;;  %684 = vmatmul.msk.f32.vlgmr.msra.gmra.mxu2 %vm425_vm6, %v544_v58 }
 0x15b   : > { %v517_v63 = vadd.f32 %v737_v52, %v516_v61 }
 0x15c   : > { %v739_v0 = vpop.eup %738 }
 0x15d   : > { %v521_v2 = vsel %vm520_vm14, %v737_v52, %v517_v63  ;;  %v529_v3 = vmul.f32 %v739_v0, %v482_v54  ;;  %vm534_vm0 = vweird.f32 %v739_v0 }
 0x15e   : > { %v526_v4 = vsel %vm523_vm15, %v525_v1, %v521_v2  ;;  %vm535_vm2 = vmor %vm533_vm1, %vm534_vm0 }
 0x15f   : > { %v545_v5 = vmul.f32 %v526_v4, %v462_v27  ;;  %v530_v6 = vsub.f32 1.0, %v529_v3 }
 0x161   : > { %v531_v8 = vmul.f32 %v739_v0, %v530_v6  ;;  %685 = vmatmul.msk.f32.gmra.mxu2 %vm425_vm6, %v545_v5 }
 0x163   : > { %v532_v10 = vadd.f32 %v739_v0, %v531_v8 }
 0x165   : > { %v536_v12 = vsel %vm535_vm2, %v739_v0, %v532_v10 }
 0x166   : > { %v541_v13 = vsel %vm538_vm3, %v540_v11, %v536_v12 }
 0x167   : > { %v546_v14 = vmul.f32 %v541_v13, %v465_v40 }
 0x169   : > { %686 = vmatmul.msk.f32.gmra.mxu2 %vm425_vm6, %v546_v14 }
 0x1c8   : > { %v584_v16 = vpop.f32.mrf.mxu1 }
 0x1c9   : > { %v585_v17 = vadd.f32 %v707_v15, %v584_v16 }
 0x1cb   : > { %597 = vst.msk [vmem:[%s280_s14] sm:$0xff] %vm596_vm4, %v585_v17 }
 0x1dc   : > { %v587_v18 = vpop.f32.mrf.mxu2 }
 0x1dd   : > { %v588_v19 = vadd.f32 %v707_v15, %v587_v18 }
 0x1df   : > { %598 = vst.msk [vmem:[%s280_s14 + $0x8] sm:$0xff] %vm596_vm4, %v588_v19 }
 0x1e4   : > { %v590_v20 = vpop.f32.mrf.mxu2 }
 0x1e5   : > { %v591_v21 = vadd.f32 %v707_v15, %v590_v20 }
 0x1e7   : > { %599 = vst.msk [vmem:[%s280_s14 + $0x10] sm:$0xff] %vm596_vm4, %v591_v21 }
 0x1ec   : > { %v593_v22 = vpop.f32.mrf.mxu2 }
 0x1ed   : > { %v594_v23 = vadd.f32 %v707_v15, %v593_v22 }
 0x1ef   : > { %600 = vst.msk [vmem:[%s280_s14 + $0x18] sm:$0xff] %vm596_vm4, %v594_v23 }
 0x1f0 PF: > { %s17_s24 = sadd.s32 1, %s746_s24  }
 0x1f1   : > { %p14_p4 = scmp.ge.s32.totalorder %s17_s24, 4  }
 0x1f3   :  { %16 = sbr.rel (!%p14_p4) target bundleno = 1 (0x1), region = 78 }

// kernel: tpu_custom_call.1
= control target key start
LH: loop header
LB: loop body
LE: loop exit
PB: predicated region body
PF: predicated region fallthrough
CT: control target
= control target key end

     0   :  { %s788_s24 = smov 0   ;;  %s864_s0 = inlined_call_operand.vmem [shape: f32[64,4], index: 0, kind: input, shape index: {}]   ;;  %s865_s1 = inlined_call_operand.vmem [shape: f32[4,32], index: 1, kind: input, shape index: {}]   ;;  %s866_s2 = inlined_call_operand.vmem [shape: f32[1,32], index: 2, kind: input, shape index: {}]   ;;  %s867_s3 = inlined_call_operand.vmem [shape: f32[32,32], index: 3, kind: input, shape index: {}]   ;;  %s868_s4 = inlined_call_operand.vmem [shape: f32[1,32], index: 4, kind: input, shape index: {}]   ;;  %s869_s5 = inlined_call_operand.vmem [shape: f32[32,2], index: 5, kind: input, shape index: {}]   ;;  %s870_s6 = inlined_call_operand.vmem [shape: f32[1,2], index: 6, kind: input, shape index: {}]   ;;  %s871_s7 = inlined_call_operand.vmem [shape: f32[64,2], index: 7, kind: output, shape index: {}]  }
   0x1 LB: > { %s657_s25 = sadd.s32 4294967295, %s746_s24   ;;  %p661_p0 = scmp.ge.s32.totalorder %s746_s24, 1  ;;  %s746_s24 = sphi %s788_s24, %s17_s24  }
   0x2   : > { %p238_p1 = scmp.lt.s32.totalorder %s746_s24, 3 }
   0x4   : > { %p239_p2 = pnand %p661_p0, %p238_p1 }
   0x5   : > { %s662_s28 = sshll.u32 (!%p239_p2), %s657_s25, 2 }
   0x6   : > { %242 = sbr.rel (%p239_p2) target bundleno = 496 (0x1f0), region = 48  ;;  %p271_p3 = scmp.lt.s32.totalorder (!%p239_p2), %s662_s28, 7 }
   0xb   : > { %v286_v0 = vld [vmem:[%s865_s1] sm:$0xf]  ;;  %vm304_vm0 = vcmask 1043456   ;;  %s873_s28 = smov (!%p271_p3, %s662_s28), 7  ;;  %vm291_vm1 = vcmask 31744   ;;  %v420_v5 = vld [vmem:[%s867_s3 + $0x18] sm:$0xff] }
   0xc   : > { %666 = vmatpush.msk.msra.mxu0 %vm304_vm0, %v286_v0  ;;  %s663_s29 = sshll.u32 %s873_s28, 3  ;;  %450 = vmatpush.msra.mxu1 %v420_v5  ;;  %v419_v6 = vld [vmem:[%s867_s3 + $0x10] sm:$0xff]  ;;  %v705_v7 = vld [vmem:[%s866_s2] ss:$0 sm:$0xff]  ;;  %v418_v8 = vld [vmem:[%s867_s3 + $0x8] sm:$0xff]  ;;  %vm425_vm6 = vcmask 261120  }
   0xd   : > { %s274_s9 = scalar_lea.vmem %s864_s0, %s663_s29  ;;  %689 = vmatpush.msra.mxu3 %v420_v5  ;;  %v417_v10 = vld [vmem:[%s867_s3] sm:$0xff]  ;;  %s280_s14 = scalar_lea.vmem %s871_s7, %s663_s29 }
   0xe   : > { %v282_v1 = vld [vmem:[%s274_s9] sm:$0xff]  ;;  %v283_v2 = vld [vmem:[%s274_s9 + $0x8] sm:$0xff]  ;;  %v284_v3 = vld [vmem:[%s274_s9 + $0x10] sm:$0xff]  ;;  %451 = vmatpush.msra.mxu1 %v419_v6 }
   0xf   : > { %667 = vmatmul.msk.f32.vlgmr.msra.gmra.mxu0 %vm291_vm1, %v282_v1  ;;  %v285_v4 = vld [vmem:[%s274_s9 + $0x18] sm:$0xff]  ;;  %690 = vmatpush.msra.mxu3 %v419_v6 }
  0x10   : > { %452 = vmatpush.msra.mxu1 %v418_v8 }
  0x11   : > { %691 = vmatpush.msra.mxu3 %v418_v8 }
  0x12   : > { %453 = vmatpush.msra.mxu1 %v417_v10 }
  0x13   : > { %692 = vmatpush.msra.mxu3 %v417_v10  ;;  %v550_v10 = vld [vmem:[%s869_s5 + $0x18] sm:$0xff] }
  0x14   : > { %579 = vmatpush.msrb.mxu1 %v550_v10  ;;  %693 = vmatpush.msra.mxu2 %v550_v10 }
  0x17   : > { %668 = vmatmul.msk.f32.gmra.mxu0 %vm291_vm1, %v283_v2 }
  0x1f   : > { %669 = vmatmul.msk.f32.gmra.mxu0 %vm291_vm1, %v284_v3 }
  0x27   : > { %670 = vmatmul.msk.f32.gmra.mxu0 %vm291_vm1, %v285_v4 }
  0x8c   : > { %v325_v9 = vpop.f32.mrf.mxu0 }
  0x8d   : > { %v326_v11 = vadd.f32 %v705_v7, %v325_v9 }
  0x8f   : > { %v671_v12 = vmul.f32 -1.442695, %v326_v11 }
  0x91   : > { %708 = vpow2.f32 %v671_v12  ;;  %v706_v12 = vld [vmem:[%s868_s4] ss:$0 sm:$0xff] }
  0x94   : > { %v328_v13 = vpop.f32.mrf.mxu0 }
  0x95   : > { %v329_v14 = vadd.f32 %v705_v7, %v328_v13  ;;  %v548_v13 = vld [vmem:[%s869_s5 + $0x8] sm:$0xff] }
  0x97   : > { %v709_v15 = vpop.eup %708  ;;  %v672_v16 = vmul.f32 -1.442695, %v329_v14 }
  0x98   : > { %v349_v17 = vadd.f32 1.0, %v709_v15  ;;  %v547_v15 = vld [vmem:[%s869_s5] sm:$0xff] }
  0x99   : > { %710 = vpow2.f32 %v672_v16 }
  0x9a   : > { %712 = vrcp.f32 %v349_v17  ;;  %v364_v26 = vand.u32 2147483648, %v349_v17  ;;  %v362_v29 = vand.u32 2147483647, %v349_v17  ;;  %vm358_vm3 = vweird.f32 %v349_v17 }
  0x9c   : > { %v331_v18 = vpop.f32.mrf.mxu0  ;;  %v365_v35 = vor.u32 1.1754944e-38, %v364_v26  ;;  %vm363_vm5 = vcmp.eq.f32.partialorder %v362_v29, 8.507059e+37 }
  0x9d   : > { %v822_v19 = vadd.f32 %v705_v7, %v331_v18 }
  0x9f   : > { %v711_v20 = vpop.eup %710  ;;  %v673_v21 = vmul.f32 -1.442695, %v822_v19 }
  0xa0   : > { %v713_v22 = vpop.eup %712  ;;  %v350_v23 = vadd.f32 1.0, %v711_v20 }
  0xa1   : > { %v354_v24 = vmul.f32 %v713_v22, %v349_v17  ;;  %714 = vpow2.f32 %v673_v21  ;;  %vm359_vm2 = vweird.f32 %v713_v22 }
  0xa2   : > { %716 = vrcp.f32 %v350_v23  ;;  %vm360_vm4 = vmor %vm358_vm3, %vm359_vm2  ;;  %v379_v42 = vand.u32 2147483648, %v350_v23  ;;  %v377_v44 = vand.u32 2147483647, %v350_v23  ;;  %vm373_vm8 = vweird.f32 %v350_v23 }
  0xa3   : > { %v355_v25 = vsub.f32 1.0, %v354_v24 }
  0xa4   : > { %v334_v27 = vpop.f32.mrf.mxu0  ;;  %v380_v48 = vor.u32 1.1754944e-38, %v379_v42  ;;  %vm378_vm10 = vcmp.eq.f32.partialorder %v377_v44, 8.507059e+37 }
  0xa5   : > { %v356_v28 = vmul.f32 %v713_v22, %v355_v25  ;;  %v825_v30 = vadd.f32 %v705_v7, %v334_v27 }
  0xa7   : > { %v715_v31 = vpop.eup %714  ;;  %v357_v32 = vadd.f32 %v713_v22, %v356_v28  ;;  %v674_v33 = vmul.f32 -1.442695, %v825_v30 }
  0xa8   : > { %v717_v34 = vpop.eup %716  ;;  %v351_v36 = vadd.f32 1.0, %v715_v31 }
  0xa9   : > { %v361_v37 = vsel %vm360_vm4, %v713_v22, %v357_v32  ;;  %v369_v38 = vmul.f32 %v717_v34, %v350_v23  ;;  %718 = vpow2.f32 %v674_v33  ;;  %vm374_vm7 = vweird.f32 %v717_v34 }
  0xaa   : > { %v366_v39 = vsel %vm363_vm5, %v365_v35, %v361_v37  ;;  %720 = vrcp.f32 %v351_v36  ;;  %vm375_vm9 = vmor %vm373_vm8, %vm374_vm7  ;;  %v394_v55 = vand.u32 2147483648, %v351_v36  ;;  %v392_v57 = vand.u32 2147483647, %v351_v36 }
  0xab   : > { %v413_v40 = vmul.f32 %v366_v39, %v326_v11  ;;  %v370_v41 = vsub.f32 1.0, %v369_v38  ;;  %vm388_vm12 = vweird.f32 %v351_v36  ;;  %v549_v11 = vld [vmem:[%s869_s5 + $0x10] sm:$0xff] }
  0xac   : > { %v395_v60 = vor.u32 1.1754944e-38, %v394_v55  ;;  %vm393_vm14 = vcmp.eq.f32.partialorder %v392_v57, 8.507059e+37  ;;  %580 = vmatpush.msrb.mxu1 %v549_v11  ;;  %694 = vmatpush.msra.mxu2 %v549_v11 }
  0xad   : > { %v371_v43 = vmul.f32 %v717_v34, %v370_v41  ;;  %675 = vmatmul.msk.f32.vlgmr.msra.gmra.mxu1 %vm425_vm6, %v413_v40 }
  0xae   : > { %581 = vmatpush.msrb.mxu1 %v548_v13  ;;  %695 = vmatpush.msra.mxu2 %v548_v13 }
  0xaf   : > { %v719_v45 = vpop.eup %718  ;;  %v372_v46 = vadd.f32 %v717_v34, %v371_v43 }
  0xb0   : > { %v721_v47 = vpop.eup %720  ;;  %v352_v49 = vadd.f32 1.0, %v719_v45  ;;  %582 = vmatpush.msrb.mxu1 %v547_v15  ;;  %696 = vmatpush.msra.mxu2 %v547_v15  ;;  %v707_v15 = vld [vmem:[%s870_s6] ss:$0 sm:$0xff] }
  0xb1   : > { %v376_v50 = vsel %vm375_vm9, %v717_v34, %v372_v46  ;;  %v384_v51 = vmul.f32 %v721_v47, %v351_v36  ;;  %vm389_vm11 = vweird.f32 %v721_v47 }
  0xb2   : > { %v381_v52 = vsel %vm378_vm10, %v380_v48, %v376_v50  ;;  %722 = vrcp.f32 %v352_v49  ;;  %vm390_vm13 = vmor %vm388_vm12, %vm389_vm11  ;;  %v409_v2 = vand.u32 2147483648, %v352_v49  ;;  %v407_v4 = vand.u32 2147483647, %v352_v49 }
  0xb3   : > { %v414_v53 = vmul.f32 %v381_v52, %v329_v14  ;;  %v385_v54 = vsub.f32 1.0, %v384_v51  ;;  %vm403_vm0 = vweird.f32 %v352_v49 }
  0xb4   : > { %v410_v6 = vor.u32 1.1754944e-38, %v409_v2  ;;  %vm408_vm2 = vcmp.eq.f32.partialorder %v407_v4, 8.507059e+37 }
  0xb5   : > { %v386_v56 = vmul.f32 %v721_v47, %v385_v54  ;;  %676 = vmatmul.msk.f32.vlgmr.msra.gmra.mxu3 %vm425_vm6, %v414_v53 }
  0xb7   : > { %v387_v58 = vadd.f32 %v721_v47, %v386_v56 }
  0xb8   : > { %v723_v59 = vpop.eup %722 }
  0xb9   : > { %v391_v61 = vsel %vm390_vm13, %v721_v47, %v387_v58  ;;  %v399_v62 = vmul.f32 %v723_v59, %v352_v49  ;;  %vm404_vm15 = vweird.f32 %v723_v59 }
  0xba   : > { %v396_v63 = vsel %vm393_vm14, %v395_v60, %v391_v61  ;;  %vm405_vm1 = vmor %vm403_vm0, %vm404_vm15 }
  0xbb   : > { %v415_v0 = vmul.f32 %v396_v63, %v822_v19  ;;  %v400_v1 = vsub.f32 1.0, %v399_v62 }
  0xbd   : > { %v401_v3 = vmul.f32 %v723_v59, %v400_v1  ;;  %677 = vmatmul.msk.f32.gmra.mxu3 %vm425_vm6, %v415_v0 }
  0xbf   : > { %v402_v5 = vadd.f32 %v723_v59, %v401_v3 }
  0xc1   : > { %v406_v7 = vsel %vm405_vm1, %v723_v59, %v402_v5 }
  0xc2   : > { %v411_v8 = vsel %vm408_vm2, %v410_v6, %v406_v7 }
  0xc3   : > { %v416_v9 = vmul.f32 %v411_v8, %v825_v30 }
  0xc5   : > { %678 = vmatmul.msk.f32.gmra.mxu3 %vm425_vm6, %v416_v9 }
 0x12a   : > { %v455_v14 = vpop.f32.mrf.mxu1 }
 0x12b   : > { %v456_v16 = vadd.f32 %v706_v12, %v455_v14 }
 0x12d   : > { %v679_v17 = vmul.f32 -1.442695, %v456_v16 }
 0x12f   : > { %724 = vpow2.f32 %v679_v17 }
 0x135   : > { %v725_v18 = vpop.eup %724 }
 0x136   : > { %v479_v19 = vadd.f32 1.0, %v725_v18 }
 0x138   : > { %726 = vrcp.f32 %v479_v19  ;;  %v458_v20 = vpop.f32.mrf.mxu3  ;;  %v494_v28 = vand.u32 2147483648, %v479_v19  ;;  %v492_v31 = vand.u32 2147483647, %v479_v19  ;;  %vm488_vm4 = vweird.f32 %v479_v19 }
 0x139   : > { %v459_v21 = vadd.f32 %v706_v12, %v458_v20 }
 0x13a   : > { %v495_v35 = vor.u32 1.1754944e-38, %v494_v28  ;;  %vm493_vm7 = vcmp.eq.f32.partialorder %v492_v31, 8.507059e+37 }
 0x13b   : > { %v680_v22 = vmul.f32 -1.442695, %v459_v21 }
 0x13d   : > { %728 = vpow2.f32 %v680_v22 }
 0x13e   : > { %v727_v23 = vpop.eup %726 }
 0x13f   : > { %v484_v24 = vmul.f32 %v727_v23, %v479_v19  ;;  %vm489_vm3 = vweird.f32 %v727_v23 }
 0x140   : > { %v461_v25 = vpop.f32.mrf.mxu3  ;;  %vm490_vm5 = vmor %vm488_vm4, %vm489_vm3  ;;  %vm596_vm4 = vcmask 15360  }
 0x141   : > { %v485_v26 = vsub.f32 1.0, %v484_v24  ;;  %v462_v27 = vadd.f32 %v706_v12, %v461_v25 }
 0x143   : > { %v729_v29 = vpop.eup %728  ;;  %v486_v30 = vmul.f32 %v727_v23, %v485_v26  ;;  %v681_v32 = vmul.f32 -1.442695, %v462_v27 }
 0x144   : > { %v480_v33 = vadd.f32 1.0, %v729_v29 }
 0x145   : > { %v487_v34 = vadd.f32 %v727_v23, %v486_v30  ;;  %730 = vpow2.f32 %v681_v32 }
 0x146   : > { %732 = vrcp.f32 %v480_v33  ;;  %v509_v47 = vand.u32 2147483648, %v480_v33  ;;  %v507_v49 = vand.u32 2147483647, %v480_v33  ;;  %vm503_vm9 = vweird.f32 %v480_v33 }
 0x147   : > { %v491_v36 = vsel %vm490_vm5, %v727_v23, %v487_v34 }
 0x148   : > { %v496_v37 = vsel %vm493_vm7, %v495_v35, %v491_v36  ;;  %v464_v38 = vpop.f32.mrf.mxu3  ;;  %v510_v53 = vor.u32 1.1754944e-38, %v509_v47  ;;  %vm508_vm11 = vcmp.eq.f32.partialorder %v507_v49, 8.507059e+37 }
 0x149   : > { %v543_v39 = vmul.f32 %v496_v37, %v456_v16  ;;  %v465_v40 = vadd.f32 %v706_v12, %v464_v38 }
 0x14b   : > { %v731_v41 = vpop.eup %730  ;;  %v682_v42 = vmul.f32 -1.442695, %v465_v40  ;;  %683 = vmatmul.msk.f32.vlgmr.msrb.gmra.mxu1 %vm425_vm6, %v543_v39 }
 0x14c   : > { %v733_v43 = vpop.eup %732  ;;  %v481_v44 = vadd.f32 1.0, %v731_v41 }
 0x14d   : > { %v499_v45 = vmul.f32 %v733_v43, %v480_v33  ;;  %734 = vpow2.f32 %v682_v42  ;;  %vm504_vm8 = vweird.f32 %v733_v43 }
 0x14e   : > { %736 = vrcp.f32 %v481_v44  ;;  %vm505_vm10 = vmor %vm503_vm9, %vm504_vm8  ;;  %v524_v60 = vand.u32 2147483648, %v481_v44  ;;  %v522_v62 = vand.u32 2147483647, %v481_v44  ;;  %vm518_vm13 = vweird.f32 %v481_v44 }
 0x14f   : > { %v500_v46 = vsub.f32 1.0, %v499_v45 }
 0x150   : > { %v525_v1 = vor.u32 1.1754944e-38, %v524_v60  ;;  %vm523_vm15 = vcmp.eq.f32.partialorder %v522_v62, 8.507059e+37 }
 0x151   : > { %v501_v48 = vmul.f32 %v733_v43, %v500_v46 }
 0x153   : > { %v735_v50 = vpop.eup %734  ;;  %v502_v51 = vadd.f32 %v733_v43, %v501_v48 }
 0x154   : > { %v737_v52 = vpop.eup %736  ;;  %v482_v54 = vadd.f32 1.0, %v735_v50 }
 0x155   : > { %v506_v55 = vsel %vm505_vm10, %v733_v43, %v502_v51  ;;  %v514_v56 = vmul.f32 %v737_v52, %v481_v44  ;;  %vm519_vm12 = vweird.f32 %v737_v52 }
 0x156   : > { %v511_v57 = vsel %vm508_vm11, %v510_v53, %v506_v55  ;;  %738 = vrcp.f32 %v482_v54  ;;  %vm520_vm14 = vmor %vm518_vm13, %vm519_vm12  ;;  %v539_v7 = vand.u32 2147483648, %v482_v54  ;;  %v537_v9 = vand.u32 2147483647, %v482_v54 }
 0x157   : > { %v544_v58 = vmul.f32 %v511_v57, %v459_v21  ;;  %v515_v59 = vsub.f32 1.0, %v514_v56  ;;  %vm533_vm1 = vweird.f32 %v482_v54 }
 0x158   : > { %v540_v11 = vor.u32 1.1754944e-38, %v539_v7  ;;  %vm538_vm3 = vcmp.eq.f32.partialorder %v537_v9, 8.507059e+37 }
 0x159   : > { %v516_v61 = vmul.f32 %v737_v52, %v515_v59  ;;  %684 = vmatmul.msk.f32.vlgmr.msra.gmra.mxu2 %vm425_vm6, %v544_v58 }
 0x15b   : > { %v517_v63 = vadd.f32 %v737_v52, %v516_v61 }
 0x15c   : > { %v739_v0 = vpop.eup %738 }
 0x15d   : > { %v521_v2 = vsel %vm520_vm14, %v737_v52, %v517_v63  ;;  %v529_v3 = vmul.f32 %v739_v0, %v482_v54  ;;  %vm534_vm0 = vweird.f32 %v739_v0 }
 0x15e   : > { %v526_v4 = vsel %vm523_vm15, %v525_v1, %v521_v2  ;;  %vm535_vm2 = vmor %vm533_vm1, %vm534_vm0 }
 0x15f   : > { %v545_v5 = vmul.f32 %v526_v4, %v462_v27  ;;  %v530_v6 = vsub.f32 1.0, %v529_v3 }
 0x161   : > { %v531_v8 = vmul.f32 %v739_v0, %v530_v6  ;;  %685 = vmatmul.msk.f32.gmra.mxu2 %vm425_vm6, %v545_v5 }
 0x163   : > { %v532_v10 = vadd.f32 %v739_v0, %v531_v8 }
 0x165   : > { %v536_v12 = vsel %vm535_vm2, %v739_v0, %v532_v10 }
 0x166   : > { %v541_v13 = vsel %vm538_vm3, %v540_v11, %v536_v12 }
 0x167   : > { %v546_v14 = vmul.f32 %v541_v13, %v465_v40 }
 0x169   : > { %686 = vmatmul.msk.f32.gmra.mxu2 %vm425_vm6, %v546_v14 }
 0x1c8   : > { %v584_v16 = vpop.f32.mrf.mxu1 }
 0x1c9   : > { %v585_v17 = vadd.f32 %v707_v15, %v584_v16 }
 0x1cb   : > { %597 = vst.msk [vmem:[%s280_s14] sm:$0xff] %vm596_vm4, %v585_v17 }
 0x1dc   : > { %v587_v18 = vpop.f32.mrf.mxu2 }
 0x1dd   : > { %v588_v19 = vadd.f32 %v707_v15, %v587_v18 }
 0x1df   : > { %598 = vst.msk [vmem:[%s280_s14 + $0x8] sm:$0xff] %vm596_vm4, %v588_v19 }
 0x1e4   : > { %v590_v20 = vpop.f32.mrf.mxu2 }
 0x1e5   : > { %v591_v21 = vadd.f32 %v707_v15, %v590_v20 }
 0x1e7   : > { %599 = vst.msk [vmem:[%s280_s14 + $0x10] sm:$0xff] %vm596_vm4, %v591_v21 }
 0x1ec   : > { %v593_v22 = vpop.f32.mrf.mxu2 }
 0x1ed   : > { %v594_v23 = vadd.f32 %v707_v15, %v593_v22 }
 0x1ef   : > { %600 = vst.msk [vmem:[%s280_s14 + $0x18] sm:$0xff] %vm596_vm4, %v594_v23 }
 0x1f0 PF: > { %s17_s24 = sadd.s32 1, %s746_s24  }
 0x1f1   : > { %p14_p4 = scmp.ge.s32.totalorder %s17_s24, 4  }
 0x1f3   :  { %16 = sbr.rel (!%p14_p4) target bundleno = 1 (0x1), region = 78 }

</bundles_post_ra>
